<compile_context>
chip_gen: v6e
topology: v6e:2x2x1
jax: 0.10.0
libtpu: 0.0.40
codegen_flags: <defaults>
</compile_context>

<pallas_src>
import jax
import jax.numpy as jnp
from jax.experimental import pallas as pl
from jax.experimental.pallas import tpu as pltpu

_LANE_TILE_CAP = 2048                  # lanes per block (multiple of 128)
_TILE_TARGET_BYTES = 2 << 20           # ~2 MiB per block
_VMEM_LIMIT_BYTES = 32 * 1024 * 1024   # safe on v5e/v6e (128 MiB) and v7x (64 MiB)


def _lane_tile(L):
    # Full last dim when small (allowed even if not 128-aligned), else a
    # 128-multiple cap so stores stay lane-dense and blocks stay bounded.
    return L if L <= _LANE_TILE_CAP else _LANE_TILE_CAP


def _sublane_tile(dim, lane_tile, itemsize):
    """Rows/channels per block: the full dim, or a multiple of 8, sized so a
    block is ~_TILE_TARGET_BYTES."""
    t = max(8, _TILE_TARGET_BYTES // max(lane_tile * itemsize, 1))
    t = min(t, dim)
    if t < dim:
        t = max(8, (t // 8) * 8)
    return t


# ---------------------------------------------------------------------------
# Kernels: pure VPU elementwise adds with broadcast.
# ---------------------------------------------------------------------------

def _rowvec_kernel(x_ref, b_ref, o_ref):
    # x: (TR, TL), b: (1, TL) -> sublane broadcast over rows.
    o_ref[...] = x_ref[...] + b_ref[...]


def _chanbias_kernel(x_ref, b_ref, o_ref):
    # x: (TN, TC, TL), b: (TC, 1) -> lane broadcast of per-channel scalar.
    o_ref[...] = x_ref[...] + b_ref[...][None, :, :]


# ---------------------------------------------------------------------------
# pallas_call wrappers.
# ---------------------------------------------------------------------------

def _add_rowvec(x2d, brow):
    """x2d: (R, L); brow: (1, L) broadcast over rows."""
    R, L = x2d.shape
    itemsize = jnp.dtype(x2d.dtype).itemsize
    TL = _lane_tile(L)
    TR = _sublane_tile(R, TL, itemsize)
    grid = (pl.cdiv(R, TR), pl.cdiv(L, TL))
    return pl.pallas_call(
        _rowvec_kernel,
        out_shape=jax.ShapeDtypeStruct((R, L), x2d.dtype),
        grid=grid,
        in_specs=[
            pl.BlockSpec((TR, TL), lambda i, j: (i, j)),
            pl.BlockSpec((1, TL), lambda i, j: (0, j)),   # bias stays resident
        ],
        out_specs=pl.BlockSpec((TR, TL), lambda i, j: (i, j)),
        compiler_params=pltpu.CompilerParams(
            dimension_semantics=("parallel", "parallel"),
            vmem_limit_bytes=_VMEM_LIMIT_BYTES,
        ),
    )(x2d, brow)


def _add_chanbias(x3d, bias_c1):
    """x3d: (N, C, L); bias_c1: (C, 1) added per channel."""
    N, C, L = x3d.shape
    itemsize = jnp.dtype(x3d.dtype).itemsize
    TL = _lane_tile(L)
    TC = _sublane_tile(C, TL, itemsize)
    TN = max(1, min(N, _TILE_TARGET_BYTES // max(TC * TL * itemsize, 1)))
    grid = (pl.cdiv(N, TN), pl.cdiv(C, TC), pl.cdiv(L, TL))
    return pl.pallas_call(
        _chanbias_kernel,
        out_shape=jax.ShapeDtypeStruct((N, C, L), x3d.dtype),
        grid=grid,
        in_specs=[
            pl.BlockSpec((TN, TC, TL), lambda n, c, l: (n, c, l)),
            pl.BlockSpec((TC, 1), lambda n, c, l: (c, 0)),  # index (C,1) bias directly
        ],
        out_specs=pl.BlockSpec((TN, TC, TL), lambda n, c, l: (n, c, l)),
        compiler_params=pltpu.CompilerParams(
            dimension_semantics=("parallel", "parallel", "parallel"),
            vmem_limit_bytes=_VMEM_LIMIT_BYTES,
        ),
    )(x3d, bias_c1)


# ---------------------------------------------------------------------------
# Public API: equivalent of AddBias.forward.
# ---------------------------------------------------------------------------

def add_bias(x, bias):
    """x: (N, C) or (N, C, H, W) [NCHW]; bias: (C,) or (C, 1)."""
    bias = jnp.asarray(bias).reshape(-1).astype(x.dtype)
    C = bias.shape[0]

    if x.ndim == 2:
        N, cc = x.shape
        assert cc == C, "channel mismatch"
        # Lane-dense repack for tiny C: view (N, C) as (N*C/128, 128) so
        # stores use full vregs instead of C/128 of each lane.
        if C < 128 and 128 % C == 0 and (N * C) % 128 == 0:
            reps = 128 // C
            x2d = x.reshape((N * C) // 128, 128)              # free reshape
            brow = jnp.tile(bias, reps).reshape(1, 128)       # tiny (512 B) pattern
            out = _add_rowvec(x2d, brow)
            return out.reshape(N, C)
        # General path: channels map to lanes.
        return _add_rowvec(x, bias.reshape(1, C))

    elif x.ndim == 4:
        N, cc, H, W = x.shape
        assert cc == C, "channel mismatch"
        x3d = x.reshape(N, C, H * W)                          # free reshape (NCHW)
        out = _add_chanbias(x3d, bias.reshape(C, 1))
        return out.reshape(N, C, H, W)

    else:
        raise ValueError("AddBias expects 2D or 4D input")


if __name__ == "__main__":
    key = jax.random.PRNGKey(0)
    kb, kb2, k1, k2, k3 = jax.random.split(key, 5)

    # ---- 4-D NCHW case: (N, C, H, W) = (2, 4, 16, 16) ----
    C = 4
    bias = jax.random.normal(kb, (C,), dtype=jnp.float32)
    x4 = jax.random.normal(k1, (2, C, 16, 16), dtype=jnp.float32)
    y4 = jax.block_until_ready(add_bias(x4, bias))
    ref4 = x4 + bias.reshape(1, C, 1, 1)
    assert jnp.allclose(y4, ref4, atol=1e-6), "4D mismatch"

    # ---- 2-D case, tiny C -> lane-dense repack path: (64, 4) ----
    x2a = jax.random.normal(k2, (64, C), dtype=jnp.float32)
    y2a = jax.block_until_ready(add_bias(x2a, bias))
    ref2a = x2a + bias.reshape(1, C)
    assert jnp.allclose(y2a, ref2a, atol=1e-6), "2D (small C) mismatch"

    # ---- 2-D case, wide C -> channels-on-lanes path: (8, 160) ----
    C2 = 160
    bias2 = jax.random.normal(kb2, (C2,), dtype=jnp.float32)
    x2b = jax.random.normal(k3, (8, C2), dtype=jnp.float32)
    y2b = jax.block_until_ready(add_bias(x2b, bias2))
    ref2b = x2b + bias2.reshape(1, C2)
    assert jnp.allclose(y2b, ref2b, atol=1e-6), "2D (wide C) mismatch"

    print("KERNEL_OK")
</pallas_src>

<mosaic_0001>
module attributes {stable_mosaic.version = 11 : i64} {
  func.func @_chanbias_kernel(%arg0: i32, %arg1: i32, %arg2: i32, %arg3: memref<2x4x256xf32, #tpu.memory_space<vmem>>, %arg4: memref<4x1xf32, #tpu.memory_space<vmem>>, %arg5: memref<2x4x256xf32, #tpu.memory_space<vmem>>) attributes {dimension_semantics = [#tpu.dimension_semantics<parallel>, #tpu.dimension_semantics<parallel>, #tpu.dimension_semantics<parallel>], iteration_bounds = array<i64: 1, 1, 1>, scalar_prefetch = 0 : i64, scratch_operands = 0 : i64, tpu.core_type = #tpu.core_type<tc>, window_params = [{transform_indices = @transform_0, window_bounds = array<i64: 2, 4, 256>}, {transform_indices = @transform_1, window_bounds = array<i64: 4, 1>}, {transform_indices = @transform_2, window_bounds = array<i64: 2, 4, 256>}]} {
    %c0 = arith.constant 0 : index
    %c0_0 = arith.constant 0 : index
    %c0_1 = arith.constant 0 : index
    %0 = vector.load %arg3[%c0, %c0_0, %c0_1] : memref<2x4x256xf32, #tpu.memory_space<vmem>>, vector<2x4x256xf32>
    %c0_2 = arith.constant 0 : index
    %c0_3 = arith.constant 0 : index
    %1 = vector.load %arg4[%c0_2, %c0_3] : memref<4x1xf32, #tpu.memory_space<vmem>>, vector<4x1xf32>
    %2 = vector.shape_cast %1 : vector<4x1xf32> to vector<1x4x1xf32>
    %3 = vector.broadcast %2 : vector<1x4x1xf32> to vector<2x4x256xf32>
    %4 = arith.addf %0, %3 : vector<2x4x256xf32>
    %c0_4 = arith.constant 0 : index
    %c0_5 = arith.constant 0 : index
    %c0_6 = arith.constant 0 : index
    %5 = vector.load %arg5[%c0_4, %c0_5, %c0_6] : memref<2x4x256xf32, #tpu.memory_space<vmem>>, vector<2x4x256xf32>
    tpu.vector_store %arg5[%c0_4, %c0_5, %c0_6], %4 {strides = array<i32>} : memref<2x4x256xf32, #tpu.memory_space<vmem>>, vector<2x4x256xf32>,
    return
  }
  func.func @transform_0(%arg0: i32, %arg1: i32, %arg2: i32) -> (i32, i32, i32) {
    %c0_i32 = arith.constant 0 : i32
    return %arg0, %arg1, %arg2 : i32, i32, i32
  }
  func.func @transform_1(%arg0: i32, %arg1: i32, %arg2: i32) -> (i32, i32) {
    %c0_i32 = arith.constant 0 : i32
    %c0_i32_0 = arith.constant 0 : i32
    return %arg1, %c0_i32 : i32, i32
  }
  func.func @transform_2(%arg0: i32, %arg1: i32, %arg2: i32) -> (i32, i32, i32) {
    %c0_i32 = arith.constant 0 : i32
    return %arg0, %arg1, %arg2 : i32, i32, i32
  }
}

</mosaic_0001>

<bundles_post_ra>
// kernel: tpu_custom_call.1
= control target key start
LH: loop header
LB: loop body
LE: loop exit
PB: predicated region body
PF: predicated region fallthrough
CT: control target
= control target key end

     0   :  { %7 = vsyncpa [#allocation3], 0  ;;  %s149_s0 = inlined_call_operand.hbm [shape: f32[2,4,256], index: 0, kind: input, shape index: {}]   ;;  %s150_s1 = inlined_call_operand.vmem [shape: f32[4,1], index: 1, kind: input, shape index: {}]   ;;  %s151_s2 = inlined_call_operand.hbm [shape: f32[2,4,256], index: 2, kind: output, shape index: {}]  }
   0x1   :  { %8 = vsyncpa [#allocation4], 0  ;;  %s113_s9 = smov [#allocation2]  }
   0x2   :  { %s14_s10 = sshll.u32 %s113_s9, 4  ;;  %s15_s10 = int_to_ptr.vmem [resolvable:$true] %s14_s10 }
   0x3   :  { %s77_s11 = scalar_lea.vmem %s15_s10, 256  ;;  %p82_p1 = scmp.lt.s32.totalorder %s15_s10, %s15_s10 }
   0x4   :  { %p78_p0 = scmp.ne.s32.totalorder %s15_s10, %s77_s11  ;;  %p83_p2 = scmp.lt.s32.totalorder %s77_s11, %s77_s11 }
   0x6   :  { %p84_p3 = por %p83_p2, %p82_p1 }
   0x8   :  { %p85_p4 = pnand %p84_p3, %p78_p0 }
   0xa   :  { %88 = shalt.err (!%p85_p4)
}
   0xb   :  { %s114_s12 = smov 128   ;;  %s115_s13 = smov 8  }
   0xc   :  { %20 = dma.hbm_to_vmem [thread:$0]  %s149_s0, 256, %s15_s10, [#allocation3], %s114_s12, %s114_s12, %s115_s13  }
   0xd   :  { %109 = dma.done.wait [#allocation3], 256  }
   0xe   :  { %110 = vsyncadd [#allocation3], 4294967040  ;;  %v116_v0 = vmov 0   ;;  %v28_v1 = vld [vmem:[%s150_s1] sm:$0xf]  ;;  %v36_v4 = vlaneseq  ;;  %v27_v10 = vld [vmem:[#allocation2 + $0x8] sm:$0xff] }
   0xf   :  { %68 = vset.pattern.permute.xlu0 %v116_v0  ;;  %v117_v2 = vmov 839922192   ;;  %v26_v9 = vld [vmem:[#allocation2] sm:$0xff]  ;;  %s118_s18 = smov [#allocation5]  }
  0x10   :  { %31 = vperm.xlu0 %68, %v28_v1   ;;  %v34_v3 = vunpack.c.l.s4 %v117_v2  ;;  %v37_v6 = vshrl.u32 %v36_v4, 7  ;;  %s50_s0 = sshll.u32 %s118_s18, 4  ;;  %s51_s0 = int_to_ptr.vmem [resolvable:$true] %s50_s0 }
  0x11   :  { %s89_s19 = scalar_lea.vmem %s51_s0, 256  ;;  %p94_p6 = scmp.lt.s32.totalorder %s51_s0, %s51_s0 }
  0x12   :  { %v35_v5 = vunpack.c.0.s8 %v34_v3  ;;  %p90_p5 = scmp.ne.s32.totalorder %s51_s0, %s89_s19  ;;  %p95_p7 = scmp.lt.s32.totalorder %s89_s19, %s89_s19 }
  0x14   :  { %v38_v7 = vsub.s32 %v35_v5, %v37_v6  ;;  %p96_p8 = por %p95_p7, %p94_p6 }
  0x16   :  { %p97_p9 = pnand %p96_p8, %p90_p5 }
  0x8b   :  { %v32_v8 = vpop.permute.xlu0 %31 }
  0x8c   :  { %v39_v11 = vrot.slane %v32_v8, %v38_v7 }
  0x8e   :  { %v41_v12 = vadd.f32 %v39_v11, %v26_v9  ;;  %v42_v13 = vadd.f32 %v39_v11, %v27_v10 }
  0x90   :  { %43 = vst [vmem:[#allocation5] sm:$0xff] %v41_v12  ;;  %44 = vst [vmem:[#allocation5 + $0x8] sm:$0xff] %v42_v13 }
  0x91   :  { %100 = shalt.err (!%p97_p9)
}
  0x92   :  { %56 = dma.vmem_to_hbm [thread:$0]  %s51_s0, 256, %s151_s2, [#allocation4], %s114_s12, %s114_s12, %s115_s13  }
  0x93   :  { %111 = dma.done.wait [#allocation4], 256  }
  0x94   :  { %112 = vsyncadd [#allocation4], 4294967040 }
  0x95   :  { %60 = vsyncpa [#allocation3], 1 }
  0x96   :  { %61 = vsyncpa [#allocation4], 1 }

</bundles_post_ra>
